<compile_context>
chip_gen: v7x
topology: tpu7x:2x2x1
jax: 0.10.0
libtpu: 0.0.40
codegen_flags: <defaults>
</compile_context>

<pallas_src>
import jax
import jax.numpy as jnp
from jax.experimental import pallas as pl
from jax.experimental.pallas import tpu as pltpu

_LANE = 128                    # vreg lane width (fast axis)
_SMALL_BYTES = 1 << 20         # below this: skip the kernel, return x
_MAX_TILE_BYTES = 8 << 20      # per-buffer tile budget (≤4 live buffers → 32 MiB)
_VMEM_LIMIT = 48 << 20         # fits v7x (64 MiB physical) and v5e/v6e (128 MiB)


def _sublane(dtype) -> int:
    """Minimum sublane granularity for an unmasked, relayout-free tile."""
    # f32 -> 8, bf16/f16 -> 16, int8/fp8 -> 32 (sub-32-bit packs along sublanes).
    return max(8, 32 // jnp.dtype(dtype).itemsize)


def _pick_lanes(total: int) -> int:
    """Widest lane-dense last dim (multiple of 128) that divides `total`."""
    for lanes in (4096, 2048, 1024, 512, 256, 128):
        if total % lanes == 0:
            return lanes
    return _LANE  # unreachable: caller guarantees total % 128 == 0


def _copy_kernel(x_ref, o_ref):
    # Pure identity: full-tile load + full-tile lane-dense store.
    o_ref[...] = x_ref[...]


def _lane_dense_copy(x2: jax.Array) -> jax.Array:
    """Tiled identity copy of a (rows, lanes) lane-dense slab through VMEM."""
    rows, lanes = x2.shape
    sub = _sublane(x2.dtype)
    bytes_per_row = lanes * x2.dtype.itemsize

    # Largest multiple-of-sublane block that fits the per-buffer budget.
    if rows * bytes_per_row <= _MAX_TILE_BYTES:
        block_rows = rows                                  # full array in one block
    else:
        block_rows = max(sub, (_MAX_TILE_BYTES // bytes_per_row) // sub * sub)

    n_blocks = pl.cdiv(rows, block_rows)
    if n_blocks == 1 and rows >= 2 * sub:
        # Force ≥2 grid steps so ("parallel",) can shard across v7x's 2 TCs.
        block_rows = ((rows + 1) // 2 + sub - 1) // sub * sub
        block_rows = min(block_rows, rows)
        n_blocks = pl.cdiv(rows, block_rows)

    block = (block_rows, lanes)

    return pl.pallas_call(
        _copy_kernel,
        out_shape=jax.ShapeDtypeStruct((rows, lanes), x2.dtype),
        grid=(n_blocks,),
        in_specs=[pl.BlockSpec(block, lambda i: (i, 0))],
        out_specs=pl.BlockSpec(block, lambda i: (i, 0)),
        compiler_params=pltpu.CompilerParams(
            dimension_semantics=("parallel",),
            vmem_limit_bytes=_VMEM_LIMIT,
        ),
    )(x2)


def stable_diffusion_1x_forward(x: jax.Array) -> jax.Array:
    """Pallas equivalent of StableDiffusion1x.forward(x) == x."""
    total = x.size
    nbytes = total * x.dtype.itemsize

    # Identity needs no data movement; only stream through the kernel when the
    # tensor is big enough that launch overhead is negligible and the layout
    # can be made lane-dense.
    if total == 0 or nbytes < _SMALL_BYTES or total % _LANE != 0:
        return x

    lanes = _pick_lanes(total)
    rows = total // lanes

    # Flatten to a lane-dense 2-D slab (contiguous reshape: layout-only),
    # run the tiled copy, restore the original shape.
    x2 = x.reshape(rows, lanes)
    y2 = _lane_dense_copy(x2)
    return y2.reshape(x.shape)


if __name__ == "__main__":
    key = jax.random.PRNGKey(0)
    k1, k2 = jax.random.split(key)

    # SD-1.x latent-sized input (N, C, H, W) — matches the module's forward
    # contract.  32 KiB → fast path (no kernel), exact identity.
    # NOTE: the module's UNet/VAE params are never used by forward(), so no
    # parameter initialization is required for exact semantics.
    x_small = jax.random.normal(k1, (2, 4, 16, 16), dtype=jnp.float32)
    y_small = jax.block_until_ready(stable_diffusion_1x_forward(x_small))
    assert y_small.shape == x_small.shape and y_small.dtype == x_small.dtype
    assert bool(jnp.array_equal(y_small, x_small))

    # A larger activation-sized tensor (2 MiB) to exercise and verify the
    # Pallas lane-dense copy path on TPU.
    x_big = jax.random.normal(k2, (2, 4, 256, 256), dtype=jnp.float32)
    y_big = jax.block_until_ready(stable_diffusion_1x_forward(x_big))
    assert y_big.shape == x_big.shape and y_big.dtype == x_big.dtype
    assert bool(jnp.array_equal(y_big, x_big))

    # TODO(synk): VAE / UNet / DDPMScheduler / ControlNet / LoRA / mapper /
    # LSTM live only in __init__ and are unused by forward(); intentionally
    # not reimplemented.
    print("KERNEL_OK")
</pallas_src>

<mosaic_0001>
module attributes {stable_mosaic.version = 11 : i64} {
  func.func @_copy_kernel(%arg0: i32, %arg1: memref<64x4096xf32, #tpu.memory_space<vmem>>, %arg2: memref<64x4096xf32, #tpu.memory_space<vmem>>) attributes {dimension_semantics = [#tpu.dimension_semantics<parallel>], iteration_bounds = array<i64: 2>, scalar_prefetch = 0 : i64, scratch_operands = 0 : i64, tpu.core_type = #tpu.core_type<tc>, window_params = [{transform_indices = @transform_0, window_bounds = array<i64: 64, 4096>}, {transform_indices = @transform_1, window_bounds = array<i64: 64, 4096>}]} {
    %c0 = arith.constant 0 : index
    %c0_0 = arith.constant 0 : index
    %0 = vector.load %arg1[%c0, %c0_0] : memref<64x4096xf32, #tpu.memory_space<vmem>>, vector<64x4096xf32>
    %c0_1 = arith.constant 0 : index
    %c0_2 = arith.constant 0 : index
    %1 = vector.load %arg2[%c0_1, %c0_2] : memref<64x4096xf32, #tpu.memory_space<vmem>>, vector<64x4096xf32>
    tpu.vector_store %arg2[%c0_1, %c0_2], %0 {strides = array<i32>} : memref<64x4096xf32, #tpu.memory_space<vmem>>, vector<64x4096xf32>,
    return
  }
  func.func @transform_0(%arg0: i32) -> (i32, i32) {
    %c0_i32 = arith.constant 0 : i32
    %c0_i32_0 = arith.constant 0 : i32
    return %arg0, %c0_i32 : i32, i32
  }
  func.func @transform_1(%arg0: i32) -> (i32, i32) {
    %c0_i32 = arith.constant 0 : i32
    %c0_i32_0 = arith.constant 0 : i32
    return %arg0, %c0_i32 : i32, i32
  }
}

</mosaic_0001>

<bundles_post_ra>
// kernel: tpu_custom_call.1
= control target key start
LH: loop header
LB: loop body
LE: loop exit
PB: predicated region body
PF: predicated region fallthrough
CT: control target
= control target key end

     0   :  { %6 = vsyncpa [#allocation3], 0  ;;  %s1601_s0 = inlined_call_operand.hbm [shape: f32[128,4096], index: 0, kind: input, shape index: {}]   ;;  %s1602_s1 = inlined_call_operand.hbm [shape: f32[128,4096], index: 1, kind: output, shape index: {}]  }
   0x1   :  { %8 = vsyncpa [#allocation3 + $0x1], 0 }
   0x2   :  { %9 = vsyncpa [#allocation4], 0 }
   0x3   :  { %11 = vsyncpa [#allocation4 + $0x1], 0  ;;  %s922_s6 = smov 0   ;;  %s924_s7 = smov 0  }
   0x4   :  { %s926_s8 = smov 0   ;;  %s928_s9 = smov 0  }
   0x5 LB: > { %s943_s10 = sadd.s32 4294967295, %s904_s9   ;;  %s738_s11 = sadd.s32 4294967294, %s904_s9   ;;  %s904_s9 = sphi %s928_s9, %s1615_s9   ;;  %s900_s8 = sphi %s926_s8, %s1614_s8   ;;  %s896_s7 = sphi %s924_s7, %s1613_s7   ;;  %s892_s6 = sphi %s922_s6, %s1612_s6  }
   0x6   : > { %s947_s12 = sadd.s32 1, %s904_s9   ;;  %s24_s13 = sadd.s32 1, %s900_s8 }
   0x7   : > { %s21_s14 = ssub.s32 %s904_s9, %s947_s12  ;;  %p31_p0 = scmp.ne.s32.totalorder %s900_s8, %s896_s7 }
   0x8   : > { %p22_p1 = scmp.eq.s32.totalorder %s21_s14, 0  ;;  %p32_p2 = scmp.eq.s32.totalorder %s904_s9, 0 }
   0x9   : > { %p37_p3 = scmp.ne.s32.totalorder %s896_s7, %s892_s6  ;;  %p38_p4 = scmp.eq.s32.totalorder %s943_s10, 0 }
   0xa   : > { %s959_s15 = scalar_select %p22_p1, %s900_s8, %s24_s13  }
   0xb   : > { %p961_p5 = por %p32_p2, %p31_p0  ;;  %p965_p6 = por %p38_p4, %p37_p3 }
   0xc   : > { %p61_p7 = scmp.eq.s32.totalorder %s943_s10, 1  ;;  %p67_p8 = scmp.eq.s32.totalorder %s738_s11, 1 }
   0xd   : > { %p770_p10 = scmp.lt.s32.totalorder %s904_s9, 2  ;;  %s87_s20 = sand.u32 1, %s900_s8  }
   0xe   : > { %p972_p11 = por %p61_p7, %p31_p0  ;;  %p976_p12 = por %p67_p8, %p37_p3 }
   0xf   : > { %s755_s21 = sshll.u32 %s904_s9, 15  ;;  %s741_s22 = sshll.u32 %s87_s20, 11 }
  0x10   : > { %s1606_s18 = scalar_select %p972_p11, 1, 0 }
  0x11   : > { %s1607_s19 = scalar_select %p976_p12, 1, 0 }
  0x12   : > { %s985_s25 = scalar_lea.hbm %s1601_s0, %s755_s21  ;;  %s91_s26 = scalar_lea.vmem [#allocation2], %s741_s22 }
  0x13   : > { %s99_s27 = sshll.u32 %s91_s26, 4  ;;  %p989_p13 = pnand %p770_p10, %p961_p5  ;;  %s993_s27 = int_to_ptr.vmem [resolvable:$true] %s99_s27 }
  0x14   : > { %s995_s29 = scalar_lea.sflag [#allocation3], %s87_s20  ;;  %s808_s30 = scalar_lea.hbm %s985_s25, 32768 }
  0x15   : > { %p809_p0 = scmp.ne.s32.totalorder %s985_s25, %s808_s30  ;;  %p810_p1 = pneg %p989_p13 }
  0x16   : > { %s813_s4 = scalar_lea.hbm %s1601_s0, 65536  ;;  %p814_p4 = scmp.lt.u32.totalorder %s985_s25, %s1601_s0 }
  0x17   : > { %p811_p2 = pnand %p810_p1, %p809_p0  ;;  %p815_p5 = scmp.lt.u32.totalorder %s813_s4, %s808_s30 }
  0x18   : > { %p817_p8 = scmp.lt.u32.totalorder %s808_s30, %s985_s25 }
  0x19   : > { %p812_p3 = pneg %p811_p2  ;;  %p816_p7 = por %p815_p5, %p814_p4 }
  0x1b   : > { %p818_p10 = por %p817_p8, %p816_p7 }
  0x1d   : > { %p819_p9 = pnand %p818_p10, %p812_p3 }
  0x1f   : > { %822 = shalt.err (!%p819_p9)
}
  0x20   : > { %s823_s13 = scalar_lea.vmem %s993_s27, 32768  ;;  %s906_s14 = smov [#allocation2]  }
  0x21   : > { %p824_p0 = scmp.ne.s32.totalorder %s993_s27, %s823_s13  ;;  %s828_s16 = sshll.u32 %s906_s14, 4  ;;  %s829_s16 = int_to_ptr.vmem [resolvable:$false] %s828_s16 }
  0x22   : > { %s830_s20 = scalar_lea.vmem %s829_s16, 65536  ;;  %p831_p11 = scmp.lt.s32.totalorder %s993_s27, %s829_s16 }
  0x23   : > { %p826_p2 = pnand %p824_p0, %p810_p1  ;;  %p832_p4 = scmp.lt.s32.totalorder %s830_s20, %s823_s13 }
  0x25   : > { %p827_p12 = pneg %p826_p2  ;;  %p833_p5 = por %p832_p4, %p831_p11 }
  0x27   : > { %p834_p7 = pnand %p833_p5, %p827_p12 }
  0x29   : > { %837 = shalt.err (!%p834_p7)
}
  0x2a   : > { %s907_s21 = smov 4096   ;;  %s908_s22 = smov 256  }
  0x2b   : > { %765 = dma.hbm_to_vmem [thread:$0]  (!%p989_p13), %s985_s25, 32768, %s993_s27, %s995_s29, %s907_s21, %s907_s21, %s908_s22  }
  0x2c   : > { %p745_p9 = scmp.ge.s32.totalorder %s904_s9, 1  ;;  %p107_p1 = scmp.lt.s32.totalorder %s904_s9, 3 }
  0x2e   : > { %p108_p3 = pnand %p745_p9, %p107_p1 }
  0x2f   : > { %s1026_s23 = sand.u32 (!%p108_p3), 1, %s896_s7  }
  0x30   : > { %111 = sbr.rel (%p108_p3) target bundleno = 199 (0xc7), region = 24  ;;  %s746_s24 = sshll.u32 (!%p108_p3), %s1026_s23, 11 }
  0x31   : > { %s114_s26 = scalar_lea.sflag (!%p108_p3), [#allocation3], %s1026_s23  ;;  %s1030_s30 = scalar_lea.vmem (!%p108_p3), [#allocation2], %s746_s24 }
  0x37   : > { %883 = dma.done.wait (%p965_p6), %s114_s26, 32768  }
  0x38   : > { %885 = vsyncadd (%p965_p6), %s114_s26, 4294934528  ;;  %v138_v0 = vld [vmem:[%s1030_s30] sm:$0xff]  ;;  %v139_v1 = vld [vmem:[%s1030_s30 + $0x8] sm:$0xff]  ;;  %s1039_s25 = scalar_lea.vmem [#allocation5], %s746_s24  ;;  %s757_s17 = sshll.u32 %s943_s10, 15 }
  0x39   : > { %v140_v2 = vld [vmem:[%s1030_s30 + $0x10] sm:$0xff]  ;;  %394 = vst [vmem:[%s1039_s25] sm:$0xff] %v138_v0  ;;  %395 = vst [vmem:[%s1039_s25 + $0x8] sm:$0xff] %v139_v1  ;;  %v141_v3 = vld [vmem:[%s1030_s30 + $0x18] sm:$0xff]  ;;  %s665_s27 = sshll.u32 %s1039_s25, 4  ;;  %s1544_s29 = scalar_lea.hbm %s1602_s1, %s757_s17  ;;  %s1546_s27 = int_to_ptr.vmem [resolvable:$true] %s665_s27 }
  0x3a   : > { %396 = vst [vmem:[%s1039_s25 + $0x10] sm:$0xff] %v140_v2  ;;  %v142_v4 = vld [vmem:[%s1030_s30 + $0x20] sm:$0xff]  ;;  %v143_v5 = vld [vmem:[%s1030_s30 + $0x28] sm:$0xff]  ;;  %397 = vst [vmem:[%s1039_s25 + $0x18] sm:$0xff] %v141_v3  ;;  %s651_s2 = scalar_lea.sflag [#allocation4], %s1026_s23  ;;  %s838_s3 = scalar_lea.vmem %s1546_s27, 32768 }
  0x3b   : > { %398 = vst [vmem:[%s1039_s25 + $0x20] sm:$0xff] %v142_v4  ;;  %399 = vst [vmem:[%s1039_s25 + $0x28] sm:$0xff] %v143_v5  ;;  %v144_v6 = vld [vmem:[%s1030_s30 + $0x30] sm:$0xff]  ;;  %v145_v7 = vld [vmem:[%s1030_s30 + $0x38] sm:$0xff]  ;;  %p839_p6 = scmp.ne.s32.totalorder %s1546_s27, %s838_s3  ;;  %p1609_p11 = scmp.ne.s32.totalorder %s1606_s18, 0 }
  0x3c   : > { %v146_v8 = vld [vmem:[%s1030_s30 + $0x40] sm:$0xff]  ;;  %400 = vst [vmem:[%s1039_s25 + $0x30] sm:$0xff] %v144_v6  ;;  %401 = vst [vmem:[%s1039_s25 + $0x38] sm:$0xff] %v145_v7  ;;  %v147_v9 = vld [vmem:[%s1030_s30 + $0x48] sm:$0xff]  ;;  %s909_s4 = smov [#allocation5]  }
  0x3d   : > { %402 = vst [vmem:[%s1039_s25 + $0x40] sm:$0xff] %v146_v8  ;;  %v148_v10 = vld [vmem:[%s1030_s30 + $0x50] sm:$0xff]  ;;  %v149_v11 = vld [vmem:[%s1030_s30 + $0x58] sm:$0xff]  ;;  %403 = vst [vmem:[%s1039_s25 + $0x48] sm:$0xff] %v147_v9  ;;  %p840_p12 = pnand %p839_p6, %p1609_p11  ;;  %s842_s5 = sshll.u32 %s909_s4, 4  ;;  %s843_s5 = int_to_ptr.vmem [resolvable:$false] %s842_s5 }
  0x3e   : > { %404 = vst [vmem:[%s1039_s25 + $0x50] sm:$0xff] %v148_v10  ;;  %405 = vst [vmem:[%s1039_s25 + $0x58] sm:$0xff] %v149_v11  ;;  %v150_v12 = vld [vmem:[%s1030_s30 + $0x60] sm:$0xff]  ;;  %v151_v13 = vld [vmem:[%s1030_s30 + $0x68] sm:$0xff]  ;;  %s844_s11 = scalar_lea.vmem %s843_s5, 65536  ;;  %p845_p8 = scmp.lt.s32.totalorder %s1546_s27, %s843_s5 }
  0x3f   : > { %v152_v14 = vld [vmem:[%s1030_s30 + $0x70] sm:$0xff]  ;;  %406 = vst [vmem:[%s1039_s25 + $0x60] sm:$0xff] %v150_v12  ;;  %407 = vst [vmem:[%s1039_s25 + $0x68] sm:$0xff] %v151_v13  ;;  %v153_v15 = vld [vmem:[%s1030_s30 + $0x78] sm:$0xff]  ;;  %p841_p13 = pneg %p840_p12  ;;  %p846_p10 = scmp.lt.s32.totalorder %s844_s11, %s838_s3 }
  0x40   : > { %408 = vst [vmem:[%s1039_s25 + $0x70] sm:$0xff] %v152_v14  ;;  %v154_v16 = vld [vmem:[%s1030_s30 + $0x80] sm:$0xff]  ;;  %v155_v17 = vld [vmem:[%s1030_s30 + $0x88] sm:$0xff]  ;;  %409 = vst [vmem:[%s1039_s25 + $0x78] sm:$0xff] %v153_v15 }
  0x41   : > { %410 = vst [vmem:[%s1039_s25 + $0x80] sm:$0xff] %v154_v16  ;;  %411 = vst [vmem:[%s1039_s25 + $0x88] sm:$0xff] %v155_v17  ;;  %v156_v18 = vld [vmem:[%s1030_s30 + $0x90] sm:$0xff]  ;;  %v157_v19 = vld [vmem:[%s1030_s30 + $0x98] sm:$0xff]  ;;  %p847_p0 = por %p846_p10, %p845_p8 }
  0x42   : > { %v158_v20 = vld [vmem:[%s1030_s30 + $0xa0] sm:$0xff]  ;;  %412 = vst [vmem:[%s1039_s25 + $0x90] sm:$0xff] %v156_v18  ;;  %413 = vst [vmem:[%s1039_s25 + $0x98] sm:$0xff] %v157_v19  ;;  %v159_v21 = vld [vmem:[%s1030_s30 + $0xa8] sm:$0xff] }
  0x43   : > { %414 = vst [vmem:[%s1039_s25 + $0xa0] sm:$0xff] %v158_v20  ;;  %v160_v22 = vld [vmem:[%s1030_s30 + $0xb0] sm:$0xff]  ;;  %v161_v23 = vld [vmem:[%s1030_s30 + $0xb8] sm:$0xff]  ;;  %415 = vst [vmem:[%s1039_s25 + $0xa8] sm:$0xff] %v159_v21  ;;  %p848_p2 = pnand %p847_p0, %p841_p13 }
  0x44   : > { %416 = vst [vmem:[%s1039_s25 + $0xb0] sm:$0xff] %v160_v22  ;;  %417 = vst [vmem:[%s1039_s25 + $0xb8] sm:$0xff] %v161_v23  ;;  %v162_v24 = vld [vmem:[%s1030_s30 + $0xc0] sm:$0xff]  ;;  %v163_v25 = vld [vmem:[%s1030_s30 + $0xc8] sm:$0xff] }
  0x45   : > { %v164_v26 = vld [vmem:[%s1030_s30 + $0xd0] sm:$0xff]  ;;  %418 = vst [vmem:[%s1039_s25 + $0xc0] sm:$0xff] %v162_v24  ;;  %419 = vst [vmem:[%s1039_s25 + $0xc8] sm:$0xff] %v163_v25  ;;  %v165_v27 = vld [vmem:[%s1030_s30 + $0xd8] sm:$0xff] }
  0x46   : > { %420 = vst [vmem:[%s1039_s25 + $0xd0] sm:$0xff] %v164_v26  ;;  %v166_v28 = vld [vmem:[%s1030_s30 + $0xe0] sm:$0xff]  ;;  %v167_v29 = vld [vmem:[%s1030_s30 + $0xe8] sm:$0xff]  ;;  %421 = vst [vmem:[%s1039_s25 + $0xd8] sm:$0xff] %v165_v27 }
  0x47   : > { %422 = vst [vmem:[%s1039_s25 + $0xe0] sm:$0xff] %v166_v28  ;;  %423 = vst [vmem:[%s1039_s25 + $0xe8] sm:$0xff] %v167_v29  ;;  %v168_v30 = vld [vmem:[%s1030_s30 + $0xf0] sm:$0xff]  ;;  %v169_v31 = vld [vmem:[%s1030_s30 + $0xf8] sm:$0xff] }
  0x48   : > { %v170_v32 = vld [vmem:[%s1030_s30 + $0x100] sm:$0xff]  ;;  %424 = vst [vmem:[%s1039_s25 + $0xf0] sm:$0xff] %v168_v30  ;;  %425 = vst [vmem:[%s1039_s25 + $0xf8] sm:$0xff] %v169_v31  ;;  %v171_v33 = vld [vmem:[%s1030_s30 + $0x108] sm:$0xff] }
  0x49   : > { %426 = vst [vmem:[%s1039_s25 + $0x100] sm:$0xff] %v170_v32  ;;  %v172_v34 = vld [vmem:[%s1030_s30 + $0x110] sm:$0xff]  ;;  %v173_v35 = vld [vmem:[%s1030_s30 + $0x118] sm:$0xff]  ;;  %427 = vst [vmem:[%s1039_s25 + $0x108] sm:$0xff] %v171_v33 }
  0x4a   : > { %428 = vst [vmem:[%s1039_s25 + $0x110] sm:$0xff] %v172_v34  ;;  %429 = vst [vmem:[%s1039_s25 + $0x118] sm:$0xff] %v173_v35  ;;  %v174_v36 = vld [vmem:[%s1030_s30 + $0x120] sm:$0xff]  ;;  %v175_v37 = vld [vmem:[%s1030_s30 + $0x128] sm:$0xff] }
  0x4b   : > { %v176_v38 = vld [vmem:[%s1030_s30 + $0x130] sm:$0xff]  ;;  %430 = vst [vmem:[%s1039_s25 + $0x120] sm:$0xff] %v174_v36  ;;  %431 = vst [vmem:[%s1039_s25 + $0x128] sm:$0xff] %v175_v37  ;;  %v177_v39 = vld [vmem:[%s1030_s30 + $0x138] sm:$0xff] }
  0x4c   : > { %432 = vst [vmem:[%s1039_s25 + $0x130] sm:$0xff] %v176_v38  ;;  %v178_v40 = vld [vmem:[%s1030_s30 + $0x140] sm:$0xff]  ;;  %v179_v41 = vld [vmem:[%s1030_s30 + $0x148] sm:$0xff]  ;;  %433 = vst [vmem:[%s1039_s25 + $0x138] sm:$0xff] %v177_v39 }
  0x4d   : > { %434 = vst [vmem:[%s1039_s25 + $0x140] sm:$0xff] %v178_v40  ;;  %435 = vst [vmem:[%s1039_s25 + $0x148] sm:$0xff] %v179_v41  ;;  %v180_v42 = vld [vmem:[%s1030_s30 + $0x150] sm:$0xff]  ;;  %v181_v43 = vld [vmem:[%s1030_s30 + $0x158] sm:$0xff] }
  0x4e   : > { %v182_v44 = vld [vmem:[%s1030_s30 + $0x160] sm:$0xff]  ;;  %436 = vst [vmem:[%s1039_s25 + $0x150] sm:$0xff] %v180_v42  ;;  %437 = vst [vmem:[%s1039_s25 + $0x158] sm:$0xff] %v181_v43  ;;  %v183_v45 = vld [vmem:[%s1030_s30 + $0x168] sm:$0xff] }
  0x4f   : > { %438 = vst [vmem:[%s1039_s25 + $0x160] sm:$0xff] %v182_v44  ;;  %v184_v46 = vld [vmem:[%s1030_s30 + $0x170] sm:$0xff]  ;;  %v185_v47 = vld [vmem:[%s1030_s30 + $0x178] sm:$0xff]  ;;  %439 = vst [vmem:[%s1039_s25 + $0x168] sm:$0xff] %v183_v45 }
  0x50   : > { %440 = vst [vmem:[%s1039_s25 + $0x170] sm:$0xff] %v184_v46  ;;  %441 = vst [vmem:[%s1039_s25 + $0x178] sm:$0xff] %v185_v47  ;;  %v186_v48 = vld [vmem:[%s1030_s30 + $0x180] sm:$0xff]  ;;  %v187_v49 = vld [vmem:[%s1030_s30 + $0x188] sm:$0xff] }
  0x51   : > { %v188_v50 = vld [vmem:[%s1030_s30 + $0x190] sm:$0xff]  ;;  %442 = vst [vmem:[%s1039_s25 + $0x180] sm:$0xff] %v186_v48  ;;  %443 = vst [vmem:[%s1039_s25 + $0x188] sm:$0xff] %v187_v49  ;;  %v189_v51 = vld [vmem:[%s1030_s30 + $0x198] sm:$0xff] }
  0x52   : > { %444 = vst [vmem:[%s1039_s25 + $0x190] sm:$0xff] %v188_v50  ;;  %v190_v52 = vld [vmem:[%s1030_s30 + $0x1a0] sm:$0xff]  ;;  %v191_v53 = vld [vmem:[%s1030_s30 + $0x1a8] sm:$0xff]  ;;  %445 = vst [vmem:[%s1039_s25 + $0x198] sm:$0xff] %v189_v51 }
  0x53   : > { %446 = vst [vmem:[%s1039_s25 + $0x1a0] sm:$0xff] %v190_v52  ;;  %447 = vst [vmem:[%s1039_s25 + $0x1a8] sm:$0xff] %v191_v53  ;;  %v192_v54 = vld [vmem:[%s1030_s30 + $0x1b0] sm:$0xff]  ;;  %v193_v55 = vld [vmem:[%s1030_s30 + $0x1b8] sm:$0xff] }
  0x54   : > { %v194_v56 = vld [vmem:[%s1030_s30 + $0x1c0] sm:$0xff]  ;;  %448 = vst [vmem:[%s1039_s25 + $0x1b0] sm:$0xff] %v192_v54  ;;  %449 = vst [vmem:[%s1039_s25 + $0x1b8] sm:$0xff] %v193_v55  ;;  %v195_v57 = vld [vmem:[%s1030_s30 + $0x1c8] sm:$0xff] }
  0x55   : > { %450 = vst [vmem:[%s1039_s25 + $0x1c0] sm:$0xff] %v194_v56  ;;  %v196_v58 = vld [vmem:[%s1030_s30 + $0x1d0] sm:$0xff]  ;;  %v197_v59 = vld [vmem:[%s1030_s30 + $0x1d8] sm:$0xff]  ;;  %451 = vst [vmem:[%s1039_s25 + $0x1c8] sm:$0xff] %v195_v57 }
  0x56   : > { %452 = vst [vmem:[%s1039_s25 + $0x1d0] sm:$0xff] %v196_v58  ;;  %453 = vst [vmem:[%s1039_s25 + $0x1d8] sm:$0xff] %v197_v59  ;;  %v198_v60 = vld [vmem:[%s1030_s30 + $0x1e0] sm:$0xff]  ;;  %v199_v61 = vld [vmem:[%s1030_s30 + $0x1e8] sm:$0xff] }
  0x57   : > { %v200_v62 = vld [vmem:[%s1030_s30 + $0x1f0] sm:$0xff]  ;;  %454 = vst [vmem:[%s1039_s25 + $0x1e0] sm:$0xff] %v198_v60  ;;  %455 = vst [vmem:[%s1039_s25 + $0x1e8] sm:$0xff] %v199_v61  ;;  %v201_v63 = vld [vmem:[%s1030_s30 + $0x1f8] sm:$0xff] }
  0x58   : > { %456 = vst [vmem:[%s1039_s25 + $0x1f0] sm:$0xff] %v200_v62  ;;  %v202_v0 = vld [vmem:[%s1030_s30 + $0x200] sm:$0xff]  ;;  %v203_v1 = vld [vmem:[%s1030_s30 + $0x208] sm:$0xff]  ;;  %457 = vst [vmem:[%s1039_s25 + $0x1f8] sm:$0xff] %v201_v63 }
  0x59   : > { %458 = vst [vmem:[%s1039_s25 + $0x200] sm:$0xff] %v202_v0  ;;  %459 = vst [vmem:[%s1039_s25 + $0x208] sm:$0xff] %v203_v1  ;;  %v204_v2 = vld [vmem:[%s1030_s30 + $0x210] sm:$0xff]  ;;  %v205_v3 = vld [vmem:[%s1030_s30 + $0x218] sm:$0xff] }
  0x5a   : > { %v206_v4 = vld [vmem:[%s1030_s30 + $0x220] sm:$0xff]  ;;  %460 = vst [vmem:[%s1039_s25 + $0x210] sm:$0xff] %v204_v2  ;;  %461 = vst [vmem:[%s1039_s25 + $0x218] sm:$0xff] %v205_v3  ;;  %v207_v5 = vld [vmem:[%s1030_s30 + $0x228] sm:$0xff] }
  0x5b   : > { %462 = vst [vmem:[%s1039_s25 + $0x220] sm:$0xff] %v206_v4  ;;  %v208_v6 = vld [vmem:[%s1030_s30 + $0x230] sm:$0xff]  ;;  %v209_v7 = vld [vmem:[%s1030_s30 + $0x238] sm:$0xff]  ;;  %463 = vst [vmem:[%s1039_s25 + $0x228] sm:$0xff] %v207_v5 }
  0x5c   : > { %464 = vst [vmem:[%s1039_s25 + $0x230] sm:$0xff] %v208_v6  ;;  %465 = vst [vmem:[%s1039_s25 + $0x238] sm:$0xff] %v209_v7  ;;  %v210_v8 = vld [vmem:[%s1030_s30 + $0x240] sm:$0xff]  ;;  %v211_v9 = vld [vmem:[%s1030_s30 + $0x248] sm:$0xff] }
  0x5d   : > { %v212_v10 = vld [vmem:[%s1030_s30 + $0x250] sm:$0xff]  ;;  %466 = vst [vmem:[%s1039_s25 + $0x240] sm:$0xff] %v210_v8  ;;  %467 = vst [vmem:[%s1039_s25 + $0x248] sm:$0xff] %v211_v9  ;;  %v213_v11 = vld [vmem:[%s1030_s30 + $0x258] sm:$0xff] }
  0x5e   : > { %468 = vst [vmem:[%s1039_s25 + $0x250] sm:$0xff] %v212_v10  ;;  %v214_v12 = vld [vmem:[%s1030_s30 + $0x260] sm:$0xff]  ;;  %v215_v13 = vld [vmem:[%s1030_s30 + $0x268] sm:$0xff]  ;;  %469 = vst [vmem:[%s1039_s25 + $0x258] sm:$0xff] %v213_v11 }
  0x5f   : > { %470 = vst [vmem:[%s1039_s25 + $0x260] sm:$0xff] %v214_v12  ;;  %471 = vst [vmem:[%s1039_s25 + $0x268] sm:$0xff] %v215_v13  ;;  %v216_v14 = vld [vmem:[%s1030_s30 + $0x270] sm:$0xff]  ;;  %v217_v15 = vld [vmem:[%s1030_s30 + $0x278] sm:$0xff] }
  0x60   : > { %v218_v16 = vld [vmem:[%s1030_s30 + $0x280] sm:$0xff]  ;;  %472 = vst [vmem:[%s1039_s25 + $0x270] sm:$0xff] %v216_v14  ;;  %473 = vst [vmem:[%s1039_s25 + $0x278] sm:$0xff] %v217_v15  ;;  %v219_v17 = vld [vmem:[%s1030_s30 + $0x288] sm:$0xff] }
  0x61   : > { %474 = vst [vmem:[%s1039_s25 + $0x280] sm:$0xff] %v218_v16  ;;  %v220_v18 = vld [vmem:[%s1030_s30 + $0x290] sm:$0xff]  ;;  %v221_v19 = vld [vmem:[%s1030_s30 + $0x298] sm:$0xff]  ;;  %475 = vst [vmem:[%s1039_s25 + $0x288] sm:$0xff] %v219_v17 }
  0x62   : > { %476 = vst [vmem:[%s1039_s25 + $0x290] sm:$0xff] %v220_v18  ;;  %477 = vst [vmem:[%s1039_s25 + $0x298] sm:$0xff] %v221_v19  ;;  %v222_v20 = vld [vmem:[%s1030_s30 + $0x2a0] sm:$0xff]  ;;  %v223_v21 = vld [vmem:[%s1030_s30 + $0x2a8] sm:$0xff] }
  0x63   : > { %v224_v22 = vld [vmem:[%s1030_s30 + $0x2b0] sm:$0xff]  ;;  %478 = vst [vmem:[%s1039_s25 + $0x2a0] sm:$0xff] %v222_v20  ;;  %479 = vst [vmem:[%s1039_s25 + $0x2a8] sm:$0xff] %v223_v21  ;;  %v225_v23 = vld [vmem:[%s1030_s30 + $0x2b8] sm:$0xff] }
  0x64   : > { %480 = vst [vmem:[%s1039_s25 + $0x2b0] sm:$0xff] %v224_v22  ;;  %v226_v24 = vld [vmem:[%s1030_s30 + $0x2c0] sm:$0xff]  ;;  %v227_v25 = vld [vmem:[%s1030_s30 + $0x2c8] sm:$0xff]  ;;  %481 = vst [vmem:[%s1039_s25 + $0x2b8] sm:$0xff] %v225_v23 }
  0x65   : > { %482 = vst [vmem:[%s1039_s25 + $0x2c0] sm:$0xff] %v226_v24  ;;  %483 = vst [vmem:[%s1039_s25 + $0x2c8] sm:$0xff] %v227_v25  ;;  %v228_v26 = vld [vmem:[%s1030_s30 + $0x2d0] sm:$0xff]  ;;  %v229_v27 = vld [vmem:[%s1030_s30 + $0x2d8] sm:$0xff] }
  0x66   : > { %v230_v28 = vld [vmem:[%s1030_s30 + $0x2e0] sm:$0xff]  ;;  %484 = vst [vmem:[%s1039_s25 + $0x2d0] sm:$0xff] %v228_v26  ;;  %485 = vst [vmem:[%s1039_s25 + $0x2d8] sm:$0xff] %v229_v27  ;;  %v231_v29 = vld [vmem:[%s1030_s30 + $0x2e8] sm:$0xff] }
  0x67   : > { %486 = vst [vmem:[%s1039_s25 + $0x2e0] sm:$0xff] %v230_v28  ;;  %v232_v30 = vld [vmem:[%s1030_s30 + $0x2f0] sm:$0xff]  ;;  %v233_v31 = vld [vmem:[%s1030_s30 + $0x2f8] sm:$0xff]  ;;  %487 = vst [vmem:[%s1039_s25 + $0x2e8] sm:$0xff] %v231_v29 }
  0x68   : > { %488 = vst [vmem:[%s1039_s25 + $0x2f0] sm:$0xff] %v232_v30  ;;  %489 = vst [vmem:[%s1039_s25 + $0x2f8] sm:$0xff] %v233_v31  ;;  %v234_v32 = vld [vmem:[%s1030_s30 + $0x300] sm:$0xff]  ;;  %v235_v33 = vld [vmem:[%s1030_s30 + $0x308] sm:$0xff] }
  0x69   : > { %v236_v34 = vld [vmem:[%s1030_s30 + $0x310] sm:$0xff]  ;;  %490 = vst [vmem:[%s1039_s25 + $0x300] sm:$0xff] %v234_v32  ;;  %491 = vst [vmem:[%s1039_s25 + $0x308] sm:$0xff] %v235_v33  ;;  %v237_v35 = vld [vmem:[%s1030_s30 + $0x318] sm:$0xff] }
  0x6a   : > { %492 = vst [vmem:[%s1039_s25 + $0x310] sm:$0xff] %v236_v34  ;;  %v238_v36 = vld [vmem:[%s1030_s30 + $0x320] sm:$0xff]  ;;  %v239_v37 = vld [vmem:[%s1030_s30 + $0x328] sm:$0xff]  ;;  %493 = vst [vmem:[%s1039_s25 + $0x318] sm:$0xff] %v237_v35 }
  0x6b   : > { %494 = vst [vmem:[%s1039_s25 + $0x320] sm:$0xff] %v238_v36  ;;  %495 = vst [vmem:[%s1039_s25 + $0x328] sm:$0xff] %v239_v37  ;;  %v240_v38 = vld [vmem:[%s1030_s30 + $0x330] sm:$0xff]  ;;  %v241_v39 = vld [vmem:[%s1030_s30 + $0x338] sm:$0xff] }
  0x6c   : > { %v242_v40 = vld [vmem:[%s1030_s30 + $0x340] sm:$0xff]  ;;  %496 = vst [vmem:[%s1039_s25 + $0x330] sm:$0xff] %v240_v38  ;;  %497 = vst [vmem:[%s1039_s25 + $0x338] sm:$0xff] %v241_v39  ;;  %v243_v41 = vld [vmem:[%s1030_s30 + $0x348] sm:$0xff] }
  0x6d   : > { %498 = vst [vmem:[%s1039_s25 + $0x340] sm:$0xff] %v242_v40  ;;  %v244_v42 = vld [vmem:[%s1030_s30 + $0x350] sm:$0xff]  ;;  %v245_v43 = vld [vmem:[%s1030_s30 + $0x358] sm:$0xff]  ;;  %499 = vst [vmem:[%s1039_s25 + $0x348] sm:$0xff] %v243_v41 }
  0x6e   : > { %500 = vst [vmem:[%s1039_s25 + $0x350] sm:$0xff] %v244_v42  ;;  %501 = vst [vmem:[%s1039_s25 + $0x358] sm:$0xff] %v245_v43  ;;  %v246_v44 = vld [vmem:[%s1030_s30 + $0x360] sm:$0xff]  ;;  %v247_v45 = vld [vmem:[%s1030_s30 + $0x368] sm:$0xff] }
  0x6f   : > { %v248_v46 = vld [vmem:[%s1030_s30 + $0x370] sm:$0xff]  ;;  %502 = vst [vmem:[%s1039_s25 + $0x360] sm:$0xff] %v246_v44  ;;  %503 = vst [vmem:[%s1039_s25 + $0x368] sm:$0xff] %v247_v45  ;;  %v249_v47 = vld [vmem:[%s1030_s30 + $0x378] sm:$0xff] }
  0x70   : > { %504 = vst [vmem:[%s1039_s25 + $0x370] sm:$0xff] %v248_v46  ;;  %v250_v48 = vld [vmem:[%s1030_s30 + $0x380] sm:$0xff]  ;;  %v251_v49 = vld [vmem:[%s1030_s30 + $0x388] sm:$0xff]  ;;  %505 = vst [vmem:[%s1039_s25 + $0x378] sm:$0xff] %v249_v47 }
  0x71   : > { %506 = vst [vmem:[%s1039_s25 + $0x380] sm:$0xff] %v250_v48  ;;  %507 = vst [vmem:[%s1039_s25 + $0x388] sm:$0xff] %v251_v49  ;;  %v252_v50 = vld [vmem:[%s1030_s30 + $0x390] sm:$0xff]  ;;  %v253_v51 = vld [vmem:[%s1030_s30 + $0x398] sm:$0xff] }
  0x72   : > { %v254_v52 = vld [vmem:[%s1030_s30 + $0x3a0] sm:$0xff]  ;;  %508 = vst [vmem:[%s1039_s25 + $0x390] sm:$0xff] %v252_v50  ;;  %509 = vst [vmem:[%s1039_s25 + $0x398] sm:$0xff] %v253_v51  ;;  %v255_v53 = vld [vmem:[%s1030_s30 + $0x3a8] sm:$0xff] }
  0x73   : > { %510 = vst [vmem:[%s1039_s25 + $0x3a0] sm:$0xff] %v254_v52  ;;  %v256_v54 = vld [vmem:[%s1030_s30 + $0x3b0] sm:$0xff]  ;;  %v257_v55 = vld [vmem:[%s1030_s30 + $0x3b8] sm:$0xff]  ;;  %511 = vst [vmem:[%s1039_s25 + $0x3a8] sm:$0xff] %v255_v53 }
  0x74   : > { %512 = vst [vmem:[%s1039_s25 + $0x3b0] sm:$0xff] %v256_v54  ;;  %513 = vst [vmem:[%s1039_s25 + $0x3b8] sm:$0xff] %v257_v55  ;;  %v258_v56 = vld [vmem:[%s1030_s30 + $0x3c0] sm:$0xff]  ;;  %v259_v57 = vld [vmem:[%s1030_s30 + $0x3c8] sm:$0xff] }
  0x75   : > { %v260_v58 = vld [vmem:[%s1030_s30 + $0x3d0] sm:$0xff]  ;;  %514 = vst [vmem:[%s1039_s25 + $0x3c0] sm:$0xff] %v258_v56  ;;  %515 = vst [vmem:[%s1039_s25 + $0x3c8] sm:$0xff] %v259_v57  ;;  %v261_v59 = vld [vmem:[%s1030_s30 + $0x3d8] sm:$0xff] }
  0x76   : > { %516 = vst [vmem:[%s1039_s25 + $0x3d0] sm:$0xff] %v260_v58  ;;  %v262_v60 = vld [vmem:[%s1030_s30 + $0x3e0] sm:$0xff]  ;;  %v263_v61 = vld [vmem:[%s1030_s30 + $0x3e8] sm:$0xff]  ;;  %517 = vst [vmem:[%s1039_s25 + $0x3d8] sm:$0xff] %v261_v59 }
  0x77   : > { %518 = vst [vmem:[%s1039_s25 + $0x3e0] sm:$0xff] %v262_v60  ;;  %519 = vst [vmem:[%s1039_s25 + $0x3e8] sm:$0xff] %v263_v61  ;;  %v264_v62 = vld [vmem:[%s1030_s30 + $0x3f0] sm:$0xff]  ;;  %v265_v63 = vld [vmem:[%s1030_s30 + $0x3f8] sm:$0xff] }
  0x78   : > { %v266_v0 = vld [vmem:[%s1030_s30 + $0x400] sm:$0xff]  ;;  %520 = vst [vmem:[%s1039_s25 + $0x3f0] sm:$0xff] %v264_v62  ;;  %521 = vst [vmem:[%s1039_s25 + $0x3f8] sm:$0xff] %v265_v63  ;;  %v267_v1 = vld [vmem:[%s1030_s30 + $0x408] sm:$0xff] }
  0x79   : > { %522 = vst [vmem:[%s1039_s25 + $0x400] sm:$0xff] %v266_v0  ;;  %v268_v2 = vld [vmem:[%s1030_s30 + $0x410] sm:$0xff]  ;;  %v269_v3 = vld [vmem:[%s1030_s30 + $0x418] sm:$0xff]  ;;  %523 = vst [vmem:[%s1039_s25 + $0x408] sm:$0xff] %v267_v1 }
  0x7a   : > { %524 = vst [vmem:[%s1039_s25 + $0x410] sm:$0xff] %v268_v2  ;;  %525 = vst [vmem:[%s1039_s25 + $0x418] sm:$0xff] %v269_v3  ;;  %v270_v4 = vld [vmem:[%s1030_s30 + $0x420] sm:$0xff]  ;;  %v271_v5 = vld [vmem:[%s1030_s30 + $0x428] sm:$0xff] }
  0x7b   : > { %v272_v6 = vld [vmem:[%s1030_s30 + $0x430] sm:$0xff]  ;;  %526 = vst [vmem:[%s1039_s25 + $0x420] sm:$0xff] %v270_v4  ;;  %527 = vst [vmem:[%s1039_s25 + $0x428] sm:$0xff] %v271_v5  ;;  %v273_v7 = vld [vmem:[%s1030_s30 + $0x438] sm:$0xff] }
  0x7c   : > { %528 = vst [vmem:[%s1039_s25 + $0x430] sm:$0xff] %v272_v6  ;;  %v274_v8 = vld [vmem:[%s1030_s30 + $0x440] sm:$0xff]  ;;  %v275_v9 = vld [vmem:[%s1030_s30 + $0x448] sm:$0xff]  ;;  %529 = vst [vmem:[%s1039_s25 + $0x438] sm:$0xff] %v273_v7 }
  0x7d   : > { %530 = vst [vmem:[%s1039_s25 + $0x440] sm:$0xff] %v274_v8  ;;  %531 = vst [vmem:[%s1039_s25 + $0x448] sm:$0xff] %v275_v9  ;;  %v276_v10 = vld [vmem:[%s1030_s30 + $0x450] sm:$0xff]  ;;  %v277_v11 = vld [vmem:[%s1030_s30 + $0x458] sm:$0xff] }
  0x7e   : > { %v278_v12 = vld [vmem:[%s1030_s30 + $0x460] sm:$0xff]  ;;  %532 = vst [vmem:[%s1039_s25 + $0x450] sm:$0xff] %v276_v10  ;;  %533 = vst [vmem:[%s1039_s25 + $0x458] sm:$0xff] %v277_v11  ;;  %v279_v13 = vld [vmem:[%s1030_s30 + $0x468] sm:$0xff] }
  0x7f   : > { %534 = vst [vmem:[%s1039_s25 + $0x460] sm:$0xff] %v278_v12  ;;  %v280_v14 = vld [vmem:[%s1030_s30 + $0x470] sm:$0xff]  ;;  %v281_v15 = vld [vmem:[%s1030_s30 + $0x478] sm:$0xff]  ;;  %535 = vst [vmem:[%s1039_s25 + $0x468] sm:$0xff] %v279_v13 }
  0x80   : > { %536 = vst [vmem:[%s1039_s25 + $0x470] sm:$0xff] %v280_v14  ;;  %537 = vst [vmem:[%s1039_s25 + $0x478] sm:$0xff] %v281_v15  ;;  %v282_v16 = vld [vmem:[%s1030_s30 + $0x480] sm:$0xff]  ;;  %v283_v17 = vld [vmem:[%s1030_s30 + $0x488] sm:$0xff] }
  0x81   : > { %v284_v18 = vld [vmem:[%s1030_s30 + $0x490] sm:$0xff]  ;;  %538 = vst [vmem:[%s1039_s25 + $0x480] sm:$0xff] %v282_v16  ;;  %539 = vst [vmem:[%s1039_s25 + $0x488] sm:$0xff] %v283_v17  ;;  %v285_v19 = vld [vmem:[%s1030_s30 + $0x498] sm:$0xff] }
  0x82   : > { %540 = vst [vmem:[%s1039_s25 + $0x490] sm:$0xff] %v284_v18  ;;  %v286_v20 = vld [vmem:[%s1030_s30 + $0x4a0] sm:$0xff]  ;;  %v287_v21 = vld [vmem:[%s1030_s30 + $0x4a8] sm:$0xff]  ;;  %541 = vst [vmem:[%s1039_s25 + $0x498] sm:$0xff] %v285_v19 }
  0x83   : > { %542 = vst [vmem:[%s1039_s25 + $0x4a0] sm:$0xff] %v286_v20  ;;  %543 = vst [vmem:[%s1039_s25 + $0x4a8] sm:$0xff] %v287_v21  ;;  %v288_v22 = vld [vmem:[%s1030_s30 + $0x4b0] sm:$0xff]  ;;  %v289_v23 = vld [vmem:[%s1030_s30 + $0x4b8] sm:$0xff] }
  0x84   : > { %v290_v24 = vld [vmem:[%s1030_s30 + $0x4c0] sm:$0xff]  ;;  %544 = vst [vmem:[%s1039_s25 + $0x4b0] sm:$0xff] %v288_v22  ;;  %545 = vst [vmem:[%s1039_s25 + $0x4b8] sm:$0xff] %v289_v23  ;;  %v291_v25 = vld [vmem:[%s1030_s30 + $0x4c8] sm:$0xff] }
  0x85   : > { %546 = vst [vmem:[%s1039_s25 + $0x4c0] sm:$0xff] %v290_v24  ;;  %v292_v26 = vld [vmem:[%s1030_s30 + $0x4d0] sm:$0xff]  ;;  %v293_v27 = vld [vmem:[%s1030_s30 + $0x4d8] sm:$0xff]  ;;  %547 = vst [vmem:[%s1039_s25 + $0x4c8] sm:$0xff] %v291_v25 }
  0x86   : > { %548 = vst [vmem:[%s1039_s25 + $0x4d0] sm:$0xff] %v292_v26  ;;  %549 = vst [vmem:[%s1039_s25 + $0x4d8] sm:$0xff] %v293_v27  ;;  %v294_v28 = vld [vmem:[%s1030_s30 + $0x4e0] sm:$0xff]  ;;  %v295_v29 = vld [vmem:[%s1030_s30 + $0x4e8] sm:$0xff] }
  0x87   : > { %v296_v30 = vld [vmem:[%s1030_s30 + $0x4f0] sm:$0xff]  ;;  %550 = vst [vmem:[%s1039_s25 + $0x4e0] sm:$0xff] %v294_v28  ;;  %551 = vst [vmem:[%s1039_s25 + $0x4e8] sm:$0xff] %v295_v29  ;;  %v297_v31 = vld [vmem:[%s1030_s30 + $0x4f8] sm:$0xff] }
  0x88   : > { %552 = vst [vmem:[%s1039_s25 + $0x4f0] sm:$0xff] %v296_v30  ;;  %v298_v32 = vld [vmem:[%s1030_s30 + $0x500] sm:$0xff]  ;;  %v299_v33 = vld [vmem:[%s1030_s30 + $0x508] sm:$0xff]  ;;  %553 = vst [vmem:[%s1039_s25 + $0x4f8] sm:$0xff] %v297_v31 }
  0x89   : > { %554 = vst [vmem:[%s1039_s25 + $0x500] sm:$0xff] %v298_v32  ;;  %555 = vst [vmem:[%s1039_s25 + $0x508] sm:$0xff] %v299_v33  ;;  %v300_v34 = vld [vmem:[%s1030_s30 + $0x510] sm:$0xff]  ;;  %v301_v35 = vld [vmem:[%s1030_s30 + $0x518] sm:$0xff] }
  0x8a   : > { %v302_v36 = vld [vmem:[%s1030_s30 + $0x520] sm:$0xff]  ;;  %556 = vst [vmem:[%s1039_s25 + $0x510] sm:$0xff] %v300_v34  ;;  %557 = vst [vmem:[%s1039_s25 + $0x518] sm:$0xff] %v301_v35  ;;  %v303_v37 = vld [vmem:[%s1030_s30 + $0x528] sm:$0xff] }
  0x8b   : > { %558 = vst [vmem:[%s1039_s25 + $0x520] sm:$0xff] %v302_v36  ;;  %v304_v38 = vld [vmem:[%s1030_s30 + $0x530] sm:$0xff]  ;;  %v305_v39 = vld [vmem:[%s1030_s30 + $0x538] sm:$0xff]  ;;  %559 = vst [vmem:[%s1039_s25 + $0x528] sm:$0xff] %v303_v37 }
  0x8c   : > { %560 = vst [vmem:[%s1039_s25 + $0x530] sm:$0xff] %v304_v38  ;;  %561 = vst [vmem:[%s1039_s25 + $0x538] sm:$0xff] %v305_v39  ;;  %v306_v40 = vld [vmem:[%s1030_s30 + $0x540] sm:$0xff]  ;;  %v307_v41 = vld [vmem:[%s1030_s30 + $0x548] sm:$0xff] }
  0x8d   : > { %v308_v42 = vld [vmem:[%s1030_s30 + $0x550] sm:$0xff]  ;;  %562 = vst [vmem:[%s1039_s25 + $0x540] sm:$0xff] %v306_v40  ;;  %563 = vst [vmem:[%s1039_s25 + $0x548] sm:$0xff] %v307_v41  ;;  %v309_v43 = vld [vmem:[%s1030_s30 + $0x558] sm:$0xff] }
  0x8e   : > { %564 = vst [vmem:[%s1039_s25 + $0x550] sm:$0xff] %v308_v42  ;;  %v310_v44 = vld [vmem:[%s1030_s30 + $0x560] sm:$0xff]  ;;  %v311_v45 = vld [vmem:[%s1030_s30 + $0x568] sm:$0xff]  ;;  %565 = vst [vmem:[%s1039_s25 + $0x558] sm:$0xff] %v309_v43 }
  0x8f   : > { %566 = vst [vmem:[%s1039_s25 + $0x560] sm:$0xff] %v310_v44  ;;  %567 = vst [vmem:[%s1039_s25 + $0x568] sm:$0xff] %v311_v45  ;;  %v312_v46 = vld [vmem:[%s1030_s30 + $0x570] sm:$0xff]  ;;  %v313_v47 = vld [vmem:[%s1030_s30 + $0x578] sm:$0xff] }
  0x90   : > { %v314_v48 = vld [vmem:[%s1030_s30 + $0x580] sm:$0xff]  ;;  %568 = vst [vmem:[%s1039_s25 + $0x570] sm:$0xff] %v312_v46  ;;  %569 = vst [vmem:[%s1039_s25 + $0x578] sm:$0xff] %v313_v47  ;;  %v315_v49 = vld [vmem:[%s1030_s30 + $0x588] sm:$0xff] }
  0x91   : > { %570 = vst [vmem:[%s1039_s25 + $0x580] sm:$0xff] %v314_v48  ;;  %v316_v50 = vld [vmem:[%s1030_s30 + $0x590] sm:$0xff]  ;;  %v317_v51 = vld [vmem:[%s1030_s30 + $0x598] sm:$0xff]  ;;  %571 = vst [vmem:[%s1039_s25 + $0x588] sm:$0xff] %v315_v49 }
  0x92   : > { %572 = vst [vmem:[%s1039_s25 + $0x590] sm:$0xff] %v316_v50  ;;  %573 = vst [vmem:[%s1039_s25 + $0x598] sm:$0xff] %v317_v51  ;;  %v318_v52 = vld [vmem:[%s1030_s30 + $0x5a0] sm:$0xff]  ;;  %v319_v53 = vld [vmem:[%s1030_s30 + $0x5a8] sm:$0xff] }
  0x93   : > { %v320_v54 = vld [vmem:[%s1030_s30 + $0x5b0] sm:$0xff]  ;;  %574 = vst [vmem:[%s1039_s25 + $0x5a0] sm:$0xff] %v318_v52  ;;  %575 = vst [vmem:[%s1039_s25 + $0x5a8] sm:$0xff] %v319_v53  ;;  %v321_v55 = vld [vmem:[%s1030_s30 + $0x5b8] sm:$0xff] }
  0x94   : > { %576 = vst [vmem:[%s1039_s25 + $0x5b0] sm:$0xff] %v320_v54  ;;  %v322_v56 = vld [vmem:[%s1030_s30 + $0x5c0] sm:$0xff]  ;;  %v323_v57 = vld [vmem:[%s1030_s30 + $0x5c8] sm:$0xff]  ;;  %577 = vst [vmem:[%s1039_s25 + $0x5b8] sm:$0xff] %v321_v55 }
  0x95   : > { %578 = vst [vmem:[%s1039_s25 + $0x5c0] sm:$0xff] %v322_v56  ;;  %579 = vst [vmem:[%s1039_s25 + $0x5c8] sm:$0xff] %v323_v57  ;;  %v324_v58 = vld [vmem:[%s1030_s30 + $0x5d0] sm:$0xff]  ;;  %v325_v59 = vld [vmem:[%s1030_s30 + $0x5d8] sm:$0xff] }
  0x96   : > { %v326_v60 = vld [vmem:[%s1030_s30 + $0x5e0] sm:$0xff]  ;;  %580 = vst [vmem:[%s1039_s25 + $0x5d0] sm:$0xff] %v324_v58  ;;  %581 = vst [vmem:[%s1039_s25 + $0x5d8] sm:$0xff] %v325_v59  ;;  %v327_v61 = vld [vmem:[%s1030_s30 + $0x5e8] sm:$0xff] }
  0x97   : > { %582 = vst [vmem:[%s1039_s25 + $0x5e0] sm:$0xff] %v326_v60  ;;  %v328_v62 = vld [vmem:[%s1030_s30 + $0x5f0] sm:$0xff]  ;;  %v329_v63 = vld [vmem:[%s1030_s30 + $0x5f8] sm:$0xff]  ;;  %583 = vst [vmem:[%s1039_s25 + $0x5e8] sm:$0xff] %v327_v61 }
  0x98   : > { %584 = vst [vmem:[%s1039_s25 + $0x5f0] sm:$0xff] %v328_v62  ;;  %585 = vst [vmem:[%s1039_s25 + $0x5f8] sm:$0xff] %v329_v63  ;;  %v330_v0 = vld [vmem:[%s1030_s30 + $0x600] sm:$0xff]  ;;  %v331_v1 = vld [vmem:[%s1030_s30 + $0x608] sm:$0xff] }
  0x99   : > { %v332_v2 = vld [vmem:[%s1030_s30 + $0x610] sm:$0xff]  ;;  %586 = vst [vmem:[%s1039_s25 + $0x600] sm:$0xff] %v330_v0  ;;  %587 = vst [vmem:[%s1039_s25 + $0x608] sm:$0xff] %v331_v1  ;;  %v333_v3 = vld [vmem:[%s1030_s30 + $0x618] sm:$0xff] }
  0x9a   : > { %588 = vst [vmem:[%s1039_s25 + $0x610] sm:$0xff] %v332_v2  ;;  %v334_v4 = vld [vmem:[%s1030_s30 + $0x620] sm:$0xff]  ;;  %v335_v5 = vld [vmem:[%s1030_s30 + $0x628] sm:$0xff]  ;;  %589 = vst [vmem:[%s1039_s25 + $0x618] sm:$0xff] %v333_v3 }
  0x9b   : > { %590 = vst [vmem:[%s1039_s25 + $0x620] sm:$0xff] %v334_v4  ;;  %591 = vst [vmem:[%s1039_s25 + $0x628] sm:$0xff] %v335_v5  ;;  %v336_v6 = vld [vmem:[%s1030_s30 + $0x630] sm:$0xff]  ;;  %v337_v7 = vld [vmem:[%s1030_s30 + $0x638] sm:$0xff] }
  0x9c   : > { %v338_v8 = vld [vmem:[%s1030_s30 + $0x640] sm:$0xff]  ;;  %592 = vst [vmem:[%s1039_s25 + $0x630] sm:$0xff] %v336_v6  ;;  %593 = vst [vmem:[%s1039_s25 + $0x638] sm:$0xff] %v337_v7  ;;  %v339_v9 = vld [vmem:[%s1030_s30 + $0x648] sm:$0xff] }
  0x9d   : > { %594 = vst [vmem:[%s1039_s25 + $0x640] sm:$0xff] %v338_v8  ;;  %v340_v10 = vld [vmem:[%s1030_s30 + $0x650] sm:$0xff]  ;;  %v341_v11 = vld [vmem:[%s1030_s30 + $0x658] sm:$0xff]  ;;  %595 = vst [vmem:[%s1039_s25 + $0x648] sm:$0xff] %v339_v9 }
  0x9e   : > { %596 = vst [vmem:[%s1039_s25 + $0x650] sm:$0xff] %v340_v10  ;;  %597 = vst [vmem:[%s1039_s25 + $0x658] sm:$0xff] %v341_v11  ;;  %v342_v12 = vld [vmem:[%s1030_s30 + $0x660] sm:$0xff]  ;;  %v343_v13 = vld [vmem:[%s1030_s30 + $0x668] sm:$0xff] }
  0x9f   : > { %v344_v14 = vld [vmem:[%s1030_s30 + $0x670] sm:$0xff]  ;;  %598 = vst [vmem:[%s1039_s25 + $0x660] sm:$0xff] %v342_v12  ;;  %599 = vst [vmem:[%s1039_s25 + $0x668] sm:$0xff] %v343_v13  ;;  %v345_v15 = vld [vmem:[%s1030_s30 + $0x678] sm:$0xff] }
  0xa0   : > { %600 = vst [vmem:[%s1039_s25 + $0x670] sm:$0xff] %v344_v14  ;;  %v346_v16 = vld [vmem:[%s1030_s30 + $0x680] sm:$0xff]  ;;  %v347_v17 = vld [vmem:[%s1030_s30 + $0x688] sm:$0xff]  ;;  %601 = vst [vmem:[%s1039_s25 + $0x678] sm:$0xff] %v345_v15 }
  0xa1   : > { %602 = vst [vmem:[%s1039_s25 + $0x680] sm:$0xff] %v346_v16  ;;  %603 = vst [vmem:[%s1039_s25 + $0x688] sm:$0xff] %v347_v17  ;;  %v348_v18 = vld [vmem:[%s1030_s30 + $0x690] sm:$0xff]  ;;  %v349_v19 = vld [vmem:[%s1030_s30 + $0x698] sm:$0xff] }
  0xa2   : > { %v350_v20 = vld [vmem:[%s1030_s30 + $0x6a0] sm:$0xff]  ;;  %604 = vst [vmem:[%s1039_s25 + $0x690] sm:$0xff] %v348_v18  ;;  %605 = vst [vmem:[%s1039_s25 + $0x698] sm:$0xff] %v349_v19  ;;  %v351_v21 = vld [vmem:[%s1030_s30 + $0x6a8] sm:$0xff] }
  0xa3   : > { %606 = vst [vmem:[%s1039_s25 + $0x6a0] sm:$0xff] %v350_v20  ;;  %v352_v22 = vld [vmem:[%s1030_s30 + $0x6b0] sm:$0xff]  ;;  %v353_v23 = vld [vmem:[%s1030_s30 + $0x6b8] sm:$0xff]  ;;  %607 = vst [vmem:[%s1039_s25 + $0x6a8] sm:$0xff] %v351_v21 }
  0xa4   : > { %608 = vst [vmem:[%s1039_s25 + $0x6b0] sm:$0xff] %v352_v22  ;;  %609 = vst [vmem:[%s1039_s25 + $0x6b8] sm:$0xff] %v353_v23  ;;  %v354_v24 = vld [vmem:[%s1030_s30 + $0x6c0] sm:$0xff]  ;;  %v355_v25 = vld [vmem:[%s1030_s30 + $0x6c8] sm:$0xff] }
  0xa5   : > { %v356_v26 = vld [vmem:[%s1030_s30 + $0x6d0] sm:$0xff]  ;;  %610 = vst [vmem:[%s1039_s25 + $0x6c0] sm:$0xff] %v354_v24  ;;  %611 = vst [vmem:[%s1039_s25 + $0x6c8] sm:$0xff] %v355_v25  ;;  %v357_v27 = vld [vmem:[%s1030_s30 + $0x6d8] sm:$0xff] }
  0xa6   : > { %612 = vst [vmem:[%s1039_s25 + $0x6d0] sm:$0xff] %v356_v26  ;;  %v358_v28 = vld [vmem:[%s1030_s30 + $0x6e0] sm:$0xff]  ;;  %v359_v29 = vld [vmem:[%s1030_s30 + $0x6e8] sm:$0xff]  ;;  %613 = vst [vmem:[%s1039_s25 + $0x6d8] sm:$0xff] %v357_v27 }
  0xa7   : > { %614 = vst [vmem:[%s1039_s25 + $0x6e0] sm:$0xff] %v358_v28  ;;  %615 = vst [vmem:[%s1039_s25 + $0x6e8] sm:$0xff] %v359_v29  ;;  %v360_v30 = vld [vmem:[%s1030_s30 + $0x6f0] sm:$0xff]  ;;  %v361_v31 = vld [vmem:[%s1030_s30 + $0x6f8] sm:$0xff] }
  0xa8   : > { %v362_v32 = vld [vmem:[%s1030_s30 + $0x700] sm:$0xff]  ;;  %616 = vst [vmem:[%s1039_s25 + $0x6f0] sm:$0xff] %v360_v30  ;;  %617 = vst [vmem:[%s1039_s25 + $0x6f8] sm:$0xff] %v361_v31  ;;  %v363_v33 = vld [vmem:[%s1030_s30 + $0x708] sm:$0xff] }
  0xa9   : > { %618 = vst [vmem:[%s1039_s25 + $0x700] sm:$0xff] %v362_v32  ;;  %v364_v34 = vld [vmem:[%s1030_s30 + $0x710] sm:$0xff]  ;;  %v365_v35 = vld [vmem:[%s1030_s30 + $0x718] sm:$0xff]  ;;  %619 = vst [vmem:[%s1039_s25 + $0x708] sm:$0xff] %v363_v33 }
  0xaa   : > { %620 = vst [vmem:[%s1039_s25 + $0x710] sm:$0xff] %v364_v34  ;;  %621 = vst [vmem:[%s1039_s25 + $0x718] sm:$0xff] %v365_v35  ;;  %v366_v36 = vld [vmem:[%s1030_s30 + $0x720] sm:$0xff]  ;;  %v367_v37 = vld [vmem:[%s1030_s30 + $0x728] sm:$0xff] }
  0xab   : > { %v368_v38 = vld [vmem:[%s1030_s30 + $0x730] sm:$0xff]  ;;  %622 = vst [vmem:[%s1039_s25 + $0x720] sm:$0xff] %v366_v36  ;;  %623 = vst [vmem:[%s1039_s25 + $0x728] sm:$0xff] %v367_v37  ;;  %v369_v39 = vld [vmem:[%s1030_s30 + $0x738] sm:$0xff] }
  0xac   : > { %624 = vst [vmem:[%s1039_s25 + $0x730] sm:$0xff] %v368_v38  ;;  %v370_v40 = vld [vmem:[%s1030_s30 + $0x740] sm:$0xff]  ;;  %v371_v41 = vld [vmem:[%s1030_s30 + $0x748] sm:$0xff]  ;;  %625 = vst [vmem:[%s1039_s25 + $0x738] sm:$0xff] %v369_v39 }
  0xad   : > { %626 = vst [vmem:[%s1039_s25 + $0x740] sm:$0xff] %v370_v40  ;;  %627 = vst [vmem:[%s1039_s25 + $0x748] sm:$0xff] %v371_v41  ;;  %v372_v42 = vld [vmem:[%s1030_s30 + $0x750] sm:$0xff]  ;;  %v373_v43 = vld [vmem:[%s1030_s30 + $0x758] sm:$0xff] }
  0xae   : > { %v374_v44 = vld [vmem:[%s1030_s30 + $0x760] sm:$0xff]  ;;  %628 = vst [vmem:[%s1039_s25 + $0x750] sm:$0xff] %v372_v42  ;;  %629 = vst [vmem:[%s1039_s25 + $0x758] sm:$0xff] %v373_v43  ;;  %v375_v45 = vld [vmem:[%s1030_s30 + $0x768] sm:$0xff] }
  0xaf   : > { %630 = vst [vmem:[%s1039_s25 + $0x760] sm:$0xff] %v374_v44  ;;  %v376_v46 = vld [vmem:[%s1030_s30 + $0x770] sm:$0xff]  ;;  %v377_v47 = vld [vmem:[%s1030_s30 + $0x778] sm:$0xff]  ;;  %631 = vst [vmem:[%s1039_s25 + $0x768] sm:$0xff] %v375_v45 }
  0xb0   : > { %632 = vst [vmem:[%s1039_s25 + $0x770] sm:$0xff] %v376_v46  ;;  %633 = vst [vmem:[%s1039_s25 + $0x778] sm:$0xff] %v377_v47  ;;  %v378_v48 = vld [vmem:[%s1030_s30 + $0x780] sm:$0xff]  ;;  %v379_v49 = vld [vmem:[%s1030_s30 + $0x788] sm:$0xff] }
  0xb1   : > { %v380_v50 = vld [vmem:[%s1030_s30 + $0x790] sm:$0xff]  ;;  %634 = vst [vmem:[%s1039_s25 + $0x780] sm:$0xff] %v378_v48  ;;  %635 = vst [vmem:[%s1039_s25 + $0x788] sm:$0xff] %v379_v49  ;;  %v381_v51 = vld [vmem:[%s1030_s30 + $0x798] sm:$0xff] }
  0xb2   : > { %636 = vst [vmem:[%s1039_s25 + $0x790] sm:$0xff] %v380_v50  ;;  %v382_v52 = vld [vmem:[%s1030_s30 + $0x7a0] sm:$0xff]  ;;  %v383_v53 = vld [vmem:[%s1030_s30 + $0x7a8] sm:$0xff]  ;;  %637 = vst [vmem:[%s1039_s25 + $0x798] sm:$0xff] %v381_v51 }
  0xb3   : > { %638 = vst [vmem:[%s1039_s25 + $0x7a0] sm:$0xff] %v382_v52  ;;  %639 = vst [vmem:[%s1039_s25 + $0x7a8] sm:$0xff] %v383_v53  ;;  %v384_v54 = vld [vmem:[%s1030_s30 + $0x7b0] sm:$0xff]  ;;  %v385_v55 = vld [vmem:[%s1030_s30 + $0x7b8] sm:$0xff] }
  0xb4   : > { %v386_v56 = vld [vmem:[%s1030_s30 + $0x7c0] sm:$0xff]  ;;  %640 = vst [vmem:[%s1039_s25 + $0x7b0] sm:$0xff] %v384_v54  ;;  %641 = vst [vmem:[%s1039_s25 + $0x7b8] sm:$0xff] %v385_v55  ;;  %v387_v57 = vld [vmem:[%s1030_s30 + $0x7c8] sm:$0xff] }
  0xb5   : > { %642 = vst [vmem:[%s1039_s25 + $0x7c0] sm:$0xff] %v386_v56  ;;  %v388_v58 = vld [vmem:[%s1030_s30 + $0x7d0] sm:$0xff]  ;;  %v389_v59 = vld [vmem:[%s1030_s30 + $0x7d8] sm:$0xff]  ;;  %643 = vst [vmem:[%s1039_s25 + $0x7c8] sm:$0xff] %v387_v57 }
  0xb6   : > { %644 = vst [vmem:[%s1039_s25 + $0x7d0] sm:$0xff] %v388_v58  ;;  %645 = vst [vmem:[%s1039_s25 + $0x7d8] sm:$0xff] %v389_v59  ;;  %v390_v60 = vld [vmem:[%s1030_s30 + $0x7e0] sm:$0xff]  ;;  %v391_v61 = vld [vmem:[%s1030_s30 + $0x7e8] sm:$0xff] }
  0xb7   : > { %v392_v62 = vld [vmem:[%s1030_s30 + $0x7f0] sm:$0xff]  ;;  %646 = vst [vmem:[%s1039_s25 + $0x7e0] sm:$0xff] %v390_v60  ;;  %647 = vst [vmem:[%s1039_s25 + $0x7e8] sm:$0xff] %v391_v61  ;;  %v393_v63 = vld [vmem:[%s1030_s30 + $0x7f8] sm:$0xff] }
  0xb8   : > { %648 = vst [vmem:[%s1039_s25 + $0x7f0] sm:$0xff] %v392_v62  ;;  %649 = vst [vmem:[%s1039_s25 + $0x7f8] sm:$0xff] %v393_v63 }
  0xb9   : > { %851 = shalt.err (!%p848_p2)
}
  0xba   : > { %s852_s13 = scalar_lea.hbm %s1544_s29, 32768  ;;  %s856_s20 = scalar_lea.hbm %s1602_s1, 65536 }
  0xbb   : > { %p853_p4 = scmp.ne.s32.totalorder %s1544_s29, %s852_s13  ;;  %p857_p9 = scmp.lt.u32.totalorder %s1544_s29, %s1602_s1 }
  0xbc   : > { %p858_p1 = scmp.lt.u32.totalorder %s856_s20, %s852_s13  ;;  %p860_p6 = scmp.lt.u32.totalorder %s852_s13, %s1544_s29 }
  0xbd   : > { %p854_p5 = pnand %p853_p4, %p1609_p11 }
  0xbe   : > { %p859_p3 = por %p858_p1, %p857_p9 }
  0xbf   : > { %p855_p7 = pneg %p854_p5 }
  0xc0   : > { %p861_p12 = por %p860_p6, %p859_p3 }
  0xc2   : > { %p862_p13 = pnand %p861_p12, %p855_p7 }
  0xc4   : > { %865 = shalt.err (!%p862_p13)
}
  0xc5   : > { %s910_s24 = smov 4096   ;;  %s911_s26 = smov 256  }
  0xc6   : > { %760 = dma.vmem_to_hbm [thread:$0]  (%p1609_p11), %s1546_s27, 32768, %s1544_s29, %s651_s2, %s910_s24, %s910_s24, %s911_s26  }
  0xc7 PF: > { %s680_s30 = sand.u32 1, %s892_s6   ;;  %p1610_p8 = scmp.ne.s32.totalorder %s1607_s19, 0 }
  0xc8   : > { %p1611_p10 = scmp.ge.s32.totalorder %s904_s9, 2  ;;  %s681_s25 = scalar_lea.sflag [#allocation4], %s680_s30 }
  0xca   : > { %p767_p0 = pnand %p1611_p10, %p1610_p8 }
  0xcc   : > { %887 = dma.done.wait (!%p767_p0), %s681_s25, 32768  }
  0xcd   : > { %889 = vsyncadd (!%p767_p0), %s681_s25, 4294934528  ;;  %p14_p2 = scmp.ge.s32.totalorder %s947_s12, 4   ;;  %s1612_s6 = smov %s896_s7 }
  0xce   : > { %s1613_s7 = smov %s900_s8  ;;  %s1614_s8 = smov %s959_s15 }
  0xcf   : > { %s1615_s9 = smov %s947_s12  ;;  %16 = sbr.rel (!%p14_p2) target bundleno = 5 (0x5), region = 69 }
  0xd6   :  { %686 = vsyncpa [#allocation3], 1 }
  0xd7   :  { %688 = vsyncpa [#allocation3 + $0x1], 1 }
  0xd8   :  { %689 = vsyncpa [#allocation4], 1 }
  0xd9   :  { %691 = vsyncpa [#allocation4 + $0x1], 1 }

</bundles_post_ra>
